<compile_context>
chip_gen: v6e
topology: v6e:2x2x1
jax: 0.10.0
libtpu: 0.0.40
codegen_flags: <defaults>
</compile_context>

<pallas_src>
import functools

import jax
import jax.numpy as jnp
from jax.experimental import pallas as pl
from jax.experimental.pallas import tpu as pltpu


def _sce_kernel(x_ref, y_ref, o_ref, acc_ref, *, alpha, eps):
    k = pl.program_id(1)

    @pl.when(k == 0)
    def _():
        acc_ref[...] = jnp.zeros_like(acc_ref)

    x = x_ref[...].astype(jnp.float32)
    y = y_ref[...].astype(jnp.float32)

    # Squared norms and dot product along the lane (feature) axis.
    ssx = jnp.sum(x * x, axis=-1, keepdims=True)   # (tile, 1)
    ssy = jnp.sum(y * y, axis=-1, keepdims=True)   # (tile, 1)
    dot = jnp.sum(x * y, axis=-1, keepdims=True)   # (tile, 1)

    eps2 = jnp.float32(eps) * jnp.float32(eps)
    cos = (dot
           * jax.lax.rsqrt(jnp.maximum(ssx, eps2))
           * jax.lax.rsqrt(jnp.maximum(ssy, eps2)))
    t = 1.0 - cos

    # alpha is a static Python value: expand small integer powers explicitly.
    if isinstance(alpha, int) and alpha > 0:
        loss = t
        for _ in range(alpha - 1):
            loss = loss * t
    elif isinstance(alpha, int):              # alpha == 0 edge case
        loss = jnp.ones_like(t)
    else:                                     # float alpha: clamp to avoid NaN
        loss = jnp.maximum(t, 0.0) ** alpha

    acc_ref[...] += loss                      # vector partial sum, no XLU reduce

    @pl.when(k == pl.num_programs(1) - 1)
    def _():
        # Fill the whole (1, 8, 128) output block with this outer block's
        # partial sum; the wrapper reads a single lane per block.
        o_ref[...] = jnp.zeros(o_ref.shape, jnp.float32) + jnp.sum(acc_ref[...])


def sce_loss_pallas(x, y, *, alpha=3, tile_rows=None):
    """Pallas implementation of SCELoss.forward (p=2, dim=-1)."""
    assert x.shape == y.shape, (x.shape, y.shape)
    D = x.shape[-1]
    xf = x.reshape(-1, D)
    yf = y.reshape(-1, D)
    N = xf.shape[0]

    itemsize = max(xf.dtype.itemsize, yf.dtype.itemsize)
    if tile_rows is None:
        # 2 inputs x 2 pipeline buffers x tile_rows x D x itemsize <= ~16 MiB.
        budget = 16 * 1024 * 1024
        tile_rows = budget // (4 * D * itemsize)
        tile_rows = max(8, min(2048, (tile_rows // 8) * 8))
    # Never tile more rows than exist (rounded up to the f32 sublane multiple).
    tile_rows = max(8, min(int(tile_rows), ((N + 7) // 8) * 8))

    n_tiles = pl.cdiv(N, tile_rows)
    n_outer = 2 if n_tiles >= 2 else 1        # v7x megacore: 2 TensorCores
    n_inner = pl.cdiv(n_tiles, n_outer)
    padded_rows = n_outer * n_inner * tile_rows
    n_pad = padded_rows - N
    if n_pad:
        xf = jnp.pad(xf, ((0, n_pad), (0, 0)))
        yf = jnp.pad(yf, ((0, n_pad), (0, 0)))

    kernel = functools.partial(_sce_kernel, alpha=alpha, eps=1e-12)
    in_map = lambda i, k, n_inner=n_inner: (i * n_inner + k, 0)

    out = pl.pallas_call(
        kernel,
        out_shape=jax.ShapeDtypeStruct((n_outer, 8, 128), jnp.float32),
        grid_spec=pltpu.PrefetchScalarGridSpec(
            num_scalar_prefetch=0,
            grid=(n_outer, n_inner),
            in_specs=[
                pl.BlockSpec((tile_rows, D), in_map),
                pl.BlockSpec((tile_rows, D), in_map),
            ],
            out_specs=pl.BlockSpec((1, 8, 128), lambda i, k: (i, 0, 0)),
            scratch_shapes=[pltpu.VMEM((tile_rows, 1), jnp.float32)],
        ),
        compiler_params=pltpu.CompilerParams(
            dimension_semantics=("parallel", "arbitrary"),
            vmem_limit_bytes=32 * 1024 * 1024,
        ),
    )(xf, yf)

    total = jnp.sum(out[:, 0, 0])
    # Zero-padded rows contribute exactly (1 - 0)**alpha == 1.0 each.
    total = total - jnp.float32(n_pad)
    return total / jnp.float32(N)


def sce_loss_ref(x, y, *, alpha=3, eps=1e-12):
    """Pure-JAX reference mirroring the PyTorch code (for correctness check)."""
    xn = x / jnp.maximum(jnp.linalg.norm(x, axis=-1, keepdims=True), eps)
    yn = y / jnp.maximum(jnp.linalg.norm(y, axis=-1, keepdims=True), eps)
    loss = (1.0 - jnp.sum(xn * yn, axis=-1)) ** alpha
    return jnp.mean(loss)


if __name__ == "__main__":
    key = jax.random.PRNGKey(0)
    kx, ky = jax.random.split(key)

    # batch=2, seq=8, hidden=32 ; normalization over the last (hidden) axis.
    x = jax.random.normal(kx, (2, 8, 32), dtype=jnp.float32)
    y = jax.random.normal(ky, (2, 8, 32), dtype=jnp.float32)

    loss = jax.block_until_ready(sce_loss_pallas(x, y, alpha=3))
    ref = sce_loss_ref(x, y, alpha=3)
    assert jnp.allclose(loss, ref, atol=1e-5, rtol=1e-5), (loss, ref)

    # Second check exercising the multi-tile path, padding, and the
    # (parallel, arbitrary) 2-D grid with small forced tiles.
    x2 = jax.random.normal(kx, (2, 20, 32), dtype=jnp.float32)   # N=40 rows
    y2 = jax.random.normal(ky, (2, 20, 32), dtype=jnp.float32)
    loss2 = jax.block_until_ready(sce_loss_pallas(x2, y2, alpha=3, tile_rows=8))
    ref2 = sce_loss_ref(x2, y2, alpha=3)
    assert jnp.allclose(loss2, ref2, atol=1e-5, rtol=1e-5), (loss2, ref2)

    print("KERNEL_OK")
</pallas_src>

<mosaic_0001>
module attributes {stable_mosaic.version = 11 : i64} {
  func.func @_sce_kernel(%arg0: i32, %arg1: i32, %arg2: memref<16x32xf32, #tpu.memory_space<vmem>>, %arg3: memref<16x32xf32, #tpu.memory_space<vmem>>, %arg4: memref<1x8x128xf32, #tpu.memory_space<vmem>>, %arg5: memref<16x1xf32, #tpu.memory_space<vmem>>) attributes {dimension_semantics = [#tpu.dimension_semantics<parallel>, #tpu.dimension_semantics<arbitrary>], iteration_bounds = array<i64: 1, 1>, scalar_prefetch = 0 : i64, scratch_operands = 1 : i64, tpu.core_type = #tpu.core_type<tc>, window_params = [{transform_indices = @transform_0, window_bounds = array<i64: 16, 32>}, {transform_indices = @transform_1, window_bounds = array<i64: 16, 32>}, {transform_indices = @transform_2, window_bounds = array<i64: 1, 8, 128>}]} {
    %c0_i32 = arith.constant 0 : i32
    %0 = arith.cmpi eq, %arg1, %c0_i32 : i32
    %1 = arith.extui %0 : i1 to i32
    %c0_i32_0 = arith.constant 0 : i32
    %2 = arith.cmpi ne, %1, %c0_i32_0 : i32
    scf.if %2 {
      %cst_15 = arith.constant 0.000000e+00 : f32
      %33 = vector.broadcast %cst_15 : f32 to vector<16x1xf32>
      %c0_16 = arith.constant 0 : index
      %c0_17 = arith.constant 0 : index
      %34 = vector.load %arg5[%c0_16, %c0_17] : memref<16x1xf32, #tpu.memory_space<vmem>>, vector<16x1xf32>
      tpu.vector_store %arg5[%c0_16, %c0_17], %33 {strides = array<i32>} : memref<16x1xf32, #tpu.memory_space<vmem>>, vector<16x1xf32>,
    } else {
    }
    %c0 = arith.constant 0 : index
    %c0_1 = arith.constant 0 : index
    %3 = vector.load %arg2[%c0, %c0_1] : memref<16x32xf32, #tpu.memory_space<vmem>>, vector<16x32xf32>
    %c0_2 = arith.constant 0 : index
    %c0_3 = arith.constant 0 : index
    %4 = vector.load %arg3[%c0_2, %c0_3] : memref<16x32xf32, #tpu.memory_space<vmem>>, vector<16x32xf32>
    %5 = arith.mulf %3, %3 : vector<16x32xf32>
    %cst = arith.constant dense<0.000000e+00> : vector<16xf32>
    %6 = vector.multi_reduction <add>, %5, %cst [1] : vector<16x32xf32> to vector<16xf32>
    %7 = vector.shape_cast %6 : vector<16xf32> to vector<16x1xf32>
    %8 = arith.mulf %4, %4 : vector<16x32xf32>
    %cst_4 = arith.constant dense<0.000000e+00> : vector<16xf32>
    %9 = vector.multi_reduction <add>, %8, %cst_4 [1] : vector<16x32xf32> to vector<16xf32>
    %10 = vector.shape_cast %9 : vector<16xf32> to vector<16x1xf32>
    %11 = arith.mulf %3, %4 : vector<16x32xf32>
    %cst_5 = arith.constant dense<0.000000e+00> : vector<16xf32>
    %12 = vector.multi_reduction <add>, %11, %cst_5 [1] : vector<16x32xf32> to vector<16xf32>
    %13 = vector.shape_cast %12 : vector<16xf32> to vector<16x1xf32>
    %cst_6 = arith.constant 9.99999996E-13 : f32
    %cst_7 = arith.constant 9.99999996E-13 : f32
    %14 = arith.mulf %cst_6, %cst_7 : f32
    %15 = vector.broadcast %14 : f32 to vector<16x1xf32>
    %16 = arith.maximumf %7, %15 : vector<16x1xf32>
    %17 = math.rsqrt %16 : vector<16x1xf32>
    %18 = arith.mulf %13, %17 : vector<16x1xf32>
    %19 = vector.broadcast %14 : f32 to vector<16x1xf32>
    %20 = arith.maximumf %10, %19 : vector<16x1xf32>
    %21 = math.rsqrt %20 : vector<16x1xf32>
    %22 = arith.mulf %18, %21 : vector<16x1xf32>
    %cst_8 = arith.constant 1.000000e+00 : f32
    %23 = vector.broadcast %cst_8 : f32 to vector<16x1xf32>
    %24 = arith.subf %23, %22 : vector<16x1xf32>
    %25 = arith.mulf %24, %24 : vector<16x1xf32>
    %26 = arith.mulf %25, %24 : vector<16x1xf32>
    %c0_9 = arith.constant 0 : index
    %c0_10 = arith.constant 0 : index
    %27 = vector.load %arg5[%c0_9, %c0_10] : memref<16x1xf32, #tpu.memory_space<vmem>>, vector<16x1xf32>
    %28 = arith.addf %27, %26 : vector<16x1xf32>
    %c0_11 = arith.constant 0 : index
    %c0_12 = arith.constant 0 : index
    %29 = vector.load %arg5[%c0_11, %c0_12] : memref<16x1xf32, #tpu.memory_space<vmem>>, vector<16x1xf32>
    tpu.vector_store %arg5[%c0_11, %c0_12], %28 {strides = array<i32>} : memref<16x1xf32, #tpu.memory_space<vmem>>, vector<16x1xf32>,
    %c0_i32_13 = arith.constant 0 : i32
    %30 = arith.cmpi eq, %arg1, %c0_i32_13 : i32
    %31 = arith.extui %30 : i1 to i32
    %c0_i32_14 = arith.constant 0 : i32
    %32 = arith.cmpi ne, %31, %c0_i32_14 : i32
    scf.if %32 {
      %cst_15 = arith.constant 0.000000e+00 : f32
      %33 = vector.broadcast %cst_15 : f32 to vector<1x8x128xf32>
      %c0_16 = arith.constant 0 : index
      %c0_17 = arith.constant 0 : index
      %34 = vector.load %arg5[%c0_16, %c0_17] : memref<16x1xf32, #tpu.memory_space<vmem>>, vector<16x1xf32>
      %35 = vector.shape_cast %34 : vector<16x1xf32> to vector<1x16x1xf32>
      %cst_18 = arith.constant dense<0.000000e+00> : vector<1xf32>
      %36 = vector.multi_reduction <add>, %35, %cst_18 [1, 2] : vector<1x16x1xf32> to vector<1xf32>
      %37 = vector.shape_cast %36 : vector<1xf32> to vector<1x1x1xf32>
      %38 = vector.extract %37[0, 0, 0] : f32 from vector<1x1x1xf32>
      %39 = vector.broadcast %38 : f32 to vector<1x8x128xf32>
      %40 = arith.addf %33, %39 : vector<1x8x128xf32>
      %c0_19 = arith.constant 0 : index
      %c0_20 = arith.constant 0 : index
      %c0_21 = arith.constant 0 : index
      %41 = vector.load %arg4[%c0_19, %c0_20, %c0_21] : memref<1x8x128xf32, #tpu.memory_space<vmem>>, vector<1x8x128xf32>
      tpu.vector_store %arg4[%c0_19, %c0_20, %c0_21], %40 {strides = array<i32>} : memref<1x8x128xf32, #tpu.memory_space<vmem>>, vector<1x8x128xf32>,
    } else {
    }
    return
  }
  func.func @transform_0(%arg0: i32, %arg1: i32) -> (i32, i32) {
    %c1_i32 = arith.constant 1 : i32
    %0 = arith.muli %arg0, %c1_i32 : i32
    %1 = arith.addi %0, %arg1 : i32
    %c0_i32 = arith.constant 0 : i32
    %c0_i32_0 = arith.constant 0 : i32
    return %1, %c0_i32 : i32, i32
  }
  func.func @transform_1(%arg0: i32, %arg1: i32) -> (i32, i32) {
    %c1_i32 = arith.constant 1 : i32
    %0 = arith.muli %arg0, %c1_i32 : i32
    %1 = arith.addi %0, %arg1 : i32
    %c0_i32 = arith.constant 0 : i32
    %c0_i32_0 = arith.constant 0 : i32
    return %1, %c0_i32 : i32, i32
  }
  func.func @transform_2(%arg0: i32, %arg1: i32) -> (i32, i32, i32) {
    %c0_i32 = arith.constant 0 : i32
    %c0_i32_0 = arith.constant 0 : i32
    %c0_i32_1 = arith.constant 0 : i32
    return %arg0, %c0_i32, %c0_i32_0 : i32, i32, i32
  }
}

</mosaic_0001>

<bundles_post_ra>
// kernel: tpu_custom_call.1
= control target key start
LH: loop header
LB: loop body
LE: loop exit
PB: predicated region body
PF: predicated region fallthrough
CT: control target
= control target key end

     0   :  { %7 = vsyncpa [#allocation4], 0  ;;  %s273_s0 = inlined_call_operand.hbm [shape: f32[16,32], index: 0, kind: input, shape index: {}]   ;;  %s274_s1 = inlined_call_operand.hbm [shape: f32[16,32], index: 1, kind: input, shape index: {}]   ;;  %s275_s2 = inlined_call_operand.hbm [shape: f32[1,8,128], index: 2, kind: output, shape index: {}]  }
   0x1   :  { %8 = vsyncpa [#allocation7], 0 }
   0x2   :  { %9 = vsyncpa [#allocation5], 0  ;;  %s231_s9 = smov [#allocation3]  }
   0x3   :  { %s19_s10 = sshll.u32 %s231_s9, 4  ;;  %s20_s10 = int_to_ptr.vmem [resolvable:$true] %s19_s10 }
   0x4   :  { %s173_s11 = scalar_lea.vmem %s20_s10, 256  ;;  %p178_p1 = scmp.lt.s32.totalorder %s20_s10, %s20_s10 }
   0x5   :  { %p174_p0 = scmp.ne.s32.totalorder %s20_s10, %s173_s11  ;;  %p179_p2 = scmp.lt.s32.totalorder %s173_s11, %s173_s11 }
   0x7   :  { %p180_p3 = por %p179_p2, %p178_p1 }
   0x9   :  { %p181_p4 = pnand %p180_p3, %p174_p0 }
   0xb   :  { %184 = shalt.err (!%p181_p4)
}
   0xc   :  { %s232_s12 = smov 128   ;;  %s233_s13 = smov 8  }
   0xd   :  { %25 = dma.hbm_to_vmem [thread:$0]  %s273_s0, 256, %s20_s10, [#allocation4], %s232_s12, %s232_s12, %s233_s13  }
   0xe   :  { %s234_s16 = smov [#allocation6]  }
   0xf   :  { %s35_s17 = sshll.u32 %s234_s16, 4  ;;  %s36_s17 = int_to_ptr.vmem [resolvable:$true] %s35_s17 }
  0x10   :  { %s193_s18 = scalar_lea.vmem %s36_s17, 256  ;;  %p198_p6 = scmp.lt.s32.totalorder %s36_s17, %s36_s17 }
  0x11   :  { %p194_p5 = scmp.ne.s32.totalorder %s36_s17, %s193_s18  ;;  %p199_p7 = scmp.lt.s32.totalorder %s193_s18, %s193_s18 }
  0x13   :  { %p200_p8 = por %p199_p7, %p198_p6 }
  0x15   :  { %p201_p9 = pnand %p200_p8, %p194_p5 }
  0x17   :  { %204 = shalt.err (!%p201_p9)
}
  0x18   :  { %41 = dma.hbm_to_vmem [thread:$0]  %s274_s1, 256, %s36_s17, [#allocation7], %s232_s12, %s232_s12, %s233_s13  }
  0x19   :  { %225 = dma.done.wait [#allocation4], 256  }
  0x1a   :  { %226 = vsyncadd [#allocation4], 4294967040 }
  0x1b   :  { %227 = dma.done.wait [#allocation7], 256  }
  0x1c   :  { %228 = vsyncadd [#allocation7], 4294967040  ;;  %v59_v0 = vld [vmem:[#allocation3] sm:$0xff]  ;;  %vm65_vm0 = vcmask 261120   ;;  %v61_v1 = vld [vmem:[#allocation6] sm:$0xff]  ;;  %vm56_vm1 = vcmask 7168  }
  0x1d   :  { %v60_v2 = vld [vmem:[#allocation3 + $0x8] sm:$0xff]  ;;  %v63_v3 = vmul.f32 %v59_v0, %v59_v0  ;;  %v72_v4 = vmul.f32 %v61_v1, %v61_v1  ;;  %v62_v6 = vld [vmem:[#allocation6 + $0x8] sm:$0xff]  ;;  %v80_v12 = vmul.f32 %v61_v1, %v59_v0  ;;  %v235_v16 = vmov 0.0   ;;  %s236_s0 = smov [#allocation8]  }
  0x1e   :  { %v64_v5 = vmul.f32 %v60_v2, %v60_v2  ;;  %v73_v7 = vmul.f32 %v62_v6, %v62_v6  ;;  %v81_v13 = vmul.f32 %v62_v6, %v60_v2  ;;  %57 = vst.msk [vmem:[#allocation2] sm:$0xff] %vm56_vm1, %v235_v16  ;;  %58 = vst.msk [vmem:[#allocation2 + $0x8] sm:$0xff] %vm56_vm1, %v235_v16  ;;  %s139_s1 = sshll.u32 %s236_s0, 4  ;;  %s140_s1 = int_to_ptr.vmem [resolvable:$true] %s139_s1 }
  0x1f   :  { %v66_v8 = vsel %vm65_vm0, %v63_v3, 0.0  ;;  %v74_v9 = vsel %vm65_vm0, %v72_v4, 0.0  ;;  %v82_v14 = vsel %vm65_vm0, %v80_v12, 0.0  ;;  %s205_s22 = scalar_lea.vmem %s140_s1, 128  ;;  %p210_p11 = scmp.lt.s32.totalorder %s140_s1, %s140_s1 }
  0x20   :  { %67 = vadd.xlane.f32.xlu0 %v66_v8  ;;  %75 = vadd.xlane.f32.xlu1 %v74_v9  ;;  %v69_v10 = vsel %vm65_vm0, %v64_v5, 0.0  ;;  %v77_v11 = vsel %vm65_vm0, %v73_v7, 0.0  ;;  %v85_v15 = vsel %vm65_vm0, %v81_v13, 0.0  ;;  %p206_p10 = scmp.ne.s32.totalorder %s140_s1, %s205_s22  ;;  %p211_p12 = scmp.lt.s32.totalorder %s205_s22, %s205_s22 }
  0x22   :  { %p212_p13 = por %p211_p12, %p210_p11 }
  0x24   :  { %70 = vadd.xlane.f32.xlu0 %v69_v10  ;;  %78 = vadd.xlane.f32.xlu1 %v77_v11  ;;  %p213_p0 = pnand %p212_p13, %p206_p10 }
  0x25   :  { %v106_v37 = vld [vmem:[#allocation2] sm:$0xff]  ;;  %v107_v42 = vld [vmem:[#allocation2 + $0x8] sm:$0xff] }
  0x28   :  { %83 = vadd.xlane.f32.xlu0 %v82_v14  ;;  %86 = vadd.xlane.f32.xlu1 %v85_v15 }
  0xa9   :  { %v68_v17 = vpop.xlane.xlu0 %67  ;;  %v76_v18 = vpop.xlane.xlu1 %75 }
  0xaa   :  { %v88_v19 = vmax.f32 %v68_v17, 1e-24  ;;  %v94_v20 = vmax.f32 %v76_v18, 1e-24 }
  0xac   :  { %157 = vrsqrt.f32 %v88_v19 }
  0xad   :  { %159 = vrsqrt.f32 %v94_v20  ;;  %v71_v21 = vpop.xlane.xlu0 %70  ;;  %v79_v22 = vpop.xlane.xlu1 %78 }
  0xae   :  { %v89_v23 = vmax.f32 %v71_v21, 1e-24  ;;  %v95_v24 = vmax.f32 %v79_v22, 1e-24 }
  0xb0   :  { %161 = vrsqrt.f32 %v89_v23 }
  0xb1   :  { %163 = vrsqrt.f32 %v95_v24  ;;  %v84_v25 = vpop.xlane.xlu0 %83  ;;  %v87_v29 = vpop.xlane.xlu1 %86 }
  0xb9   :  { %v158_v26 = vpop.eup %157 }
  0xba   :  { %v160_v27 = vpop.eup %159  ;;  %v92_v28 = vmul.f32 %v158_v26, %v84_v25 }
  0xbc   :  { %v98_v30 = vmul.f32 %v160_v27, %v92_v28 }
  0xbd   :  { %v162_v31 = vpop.eup %161 }
  0xbe   :  { %v164_v32 = vpop.eup %163  ;;  %v100_v33 = vsub.f32 1.0, %v98_v30  ;;  %v93_v34 = vmul.f32 %v162_v31, %v87_v29 }
  0xc0   :  { %v102_v35 = vmul.f32 %v100_v33, %v100_v33  ;;  %v99_v36 = vmul.f32 %v164_v32, %v93_v34 }
  0xc2   :  { %v104_v38 = vmul.f32 %v102_v35, %v100_v33  ;;  %v101_v39 = vsub.f32 1.0, %v99_v36 }
  0xc4   :  { %v108_v40 = vadd.f32 %v106_v37, %v104_v38  ;;  %v103_v41 = vmul.f32 %v101_v39, %v101_v39 }
  0xc6   :  { %111 = vst.msk [vmem:[#allocation2] sm:$0xff] %vm56_vm1, %v108_v40  ;;  %v105_v43 = vmul.f32 %v103_v41, %v101_v39 }
  0xc8   :  { %v109_v44 = vadd.f32 %v107_v42, %v105_v43 }
  0xca   :  { %112 = vst.msk [vmem:[#allocation2 + $0x8] sm:$0xff] %vm56_vm1, %v109_v44 }
  0xcd   :  { %v116_v45 = vld [vmem:[#allocation2] sm:$0xff] }
  0xce   :  { %v118_v47 = vsel %vm56_vm1, %v116_v45, 0.0 }
  0xd1   :  { %v117_v46 = vld [vmem:[#allocation2 + $0x8] sm:$0xff] }
  0xd2   :  { %v119_v48 = vsel %vm56_vm1, %v117_v46, 0.0 }
  0xd3   :  { %v120_v49 = vadd.f32 %v119_v48, %v118_v47 }
  0xd5   :  { %121 = vadd.xlane.f32.xlu0 %v120_v49 }
 0x15e   :  { %v122_v50 = vpop.xlane.xlu0 %121 }
 0x15f   :  { %v123_v51 = vrot.slane %v122_v50, 4 }
 0x161   :  { %v124_v52 = vadd.f32 %v123_v51, %v122_v50 }
 0x163   :  { %v125_v53 = vrot.slane %v124_v52, 2 }
 0x165   :  { %v126_v54 = vadd.f32 %v125_v53, %v124_v52 }
 0x167   :  { %v127_v55 = vrot.slane %v126_v54, 1 }
 0x169   :  { %v128_v56 = vadd.f32 %v127_v55, %v126_v54 }
 0x16b   :  { %149 = vpush %v128_v56 }
 0x19c   :  { %s150_s21 = spop %149 }
 0x19d   :  { %v130_v57 = vstv %s150_s21 }
 0x19e   :  { %132 = vst [vmem:[#allocation8] sm:$0xff] %v130_v57 }
 0x19f   :  { %216 = shalt.err (!%p213_p0)
}
 0x1a0   :  { %142 = dma.vmem_to_hbm [thread:$0]  %s140_s1, 128, %s275_s2, [#allocation5]  }
 0x1a1   :  { %229 = dma.done.wait [#allocation5], 128  }
 0x1a2   :  { %230 = vsyncadd [#allocation5], 4294967168 }
 0x1a3   :  { %146 = vsyncpa [#allocation4], 1 }
 0x1a4   :  { %147 = vsyncpa [#allocation7], 1 }
 0x1a5   :  { %148 = vsyncpa [#allocation5], 1 }

</bundles_post_ra>
